<compile_context>
chip_gen: v7x
topology: tpu7x:2x2x1
jax: 0.10.0
libtpu: 0.0.40
codegen_flags: <defaults>
</compile_context>

<pallas_src>
import functools

import jax
import jax.numpy as jnp
from jax.experimental import pallas as pl
from jax.experimental.pallas import tpu as pltpu


def _focal_loss_kernel(x_ref, t_ref, o_ref, *, alpha, gamma, from_logits):
    # x_ref: (C, bn)  — classes on sublanes, samples on lanes (lane-dense).
    # t_ref: (1, bn)  — int32 class index per sample.
    # o_ref: (1, bn)  — per-sample focal loss (f32), lane-dense store.
    x = x_ref[...].astype(jnp.float32)
    tgt = t_ref[...]

    # One-hot gather of the target logit / prob along the class (sublane) axis.
    cls = jax.lax.broadcasted_iota(jnp.int32, x.shape, 0)          # (C, bn)
    onehot = cls == tgt                                            # (C, bn)
    x_t = jnp.sum(jnp.where(onehot, x, 0.0), axis=0, keepdims=True)  # (1, bn)

    if from_logits:
        # Numerically stable log-sum-exp over the class (sublane) axis.
        m = jnp.max(x, axis=0, keepdims=True)                      # (1, bn)
        lse = m + jnp.log(jnp.sum(jnp.exp(x - m), axis=0, keepdims=True))
        ce = lse - x_t                                             # (1, bn)
    else:
        # inputs are probabilities: nll_loss(log(p), t) = -log(p[t])
        ce = -jnp.log(x_t)

    pt = jnp.exp(-ce)
    d = 1.0 - pt

    # Integer-gamma fast path: repeated VPU multiplies instead of exp(g*log(d))
    # (avoids two EUP transcendentals per sample and the log(0) edge at pt==1).
    g = float(gamma)
    gi = int(g)
    if g == float(gi) and gi >= 0:
        if gi == 0:
            mod = jnp.ones_like(d)
        else:
            mod = d
            for _ in range(gi - 1):
                mod = mod * d
    else:
        mod = jnp.power(jnp.maximum(d, jnp.float32(1e-30)), jnp.float32(g))

    focal = mod * ce
    if float(alpha) != 1.0:
        focal = jnp.float32(alpha) * focal

    o_ref[...] = focal


def _pick_block_n(n, c, requested):
    """Largest lane-aligned sample tile under a gen-safe VMEM budget."""
    # ~8 MiB for the double-buffered logits stream: comfortably inside the
    # scoped-VMEM default on v5e (16 MiB) and v6e/v7x (32 MiB).
    budget_bytes = 8 * 1024 * 1024
    max_bn = budget_bytes // (2 * 4 * max(c, 1))
    bn = min(int(requested), int(max_bn))
    bn = max(128, (bn // 128) * 128)
    n_pad128 = ((n + 127) // 128) * 128
    if bn >= n_pad128:
        bn = n_pad128
    return bn


def focal_loss(logits, targets, *, alpha=1.0, gamma=2.0, from_logits=True,
               reduction="mean", block_n=2048):
    """Focal loss matching the PyTorch module's forward.

    logits:  (N, C) raw logits (or probabilities if from_logits=False);
             any float dtype (bf16 inputs are cast to f32 inside the kernel).
    targets: (N,) integer class indices.
    """
    n, c = logits.shape
    targets = targets.astype(jnp.int32)

    # Class-major, sample-minor layout: samples map to the 128-lane axis.
    # (One XLA transpose pass; producers emitting (C, N) logits skip this.)
    x_cm = jnp.transpose(logits)            # (C, N)
    t_cm = targets.reshape(1, n)            # (1, N)

    bn = _pick_block_n(n, c, block_n)
    n_pad = ((n + bn - 1) // bn) * bn
    if n_pad != n:
        x_cm = jnp.pad(x_cm, ((0, 0), (0, n_pad - n)))
        t_cm = jnp.pad(t_cm, ((0, 0), (0, n_pad - n)))

    kernel = functools.partial(
        _focal_loss_kernel,
        alpha=float(alpha),
        gamma=float(gamma),
        from_logits=bool(from_logits),
    )

    focal_padded = pl.pallas_call(
        kernel,
        out_shape=jax.ShapeDtypeStruct((1, n_pad), jnp.float32),
        grid=(n_pad // bn,),
        in_specs=[
            pl.BlockSpec((c, bn), lambda i: (0, i)),   # logits, class-major
            pl.BlockSpec((1, bn), lambda i: (0, i)),   # targets
        ],
        out_specs=pl.BlockSpec((1, bn), lambda i: (0, i)),
        compiler_params=pltpu.CompilerParams(
            dimension_semantics=("parallel",),         # independent blocks -> both v7x TCs
        ),
    )(x_cm, t_cm)

    focal = focal_padded[0, :n]                        # drop padded samples

    if reduction == "mean":
        return jnp.mean(focal)
    elif reduction == "sum":
        return jnp.sum(focal)
    else:
        return focal


def _focal_loss_ref(logits, targets, alpha=1.0, gamma=2.0, reduction="mean"):
    """Plain-JAX reference mirroring the PyTorch forward (logits=True)."""
    lse = jax.scipy.special.logsumexp(logits, axis=-1)
    logit_t = jnp.take_along_axis(logits, targets[:, None], axis=-1)[:, 0]
    ce = lse - logit_t
    pt = jnp.exp(-ce)
    focal = alpha * (1.0 - pt) ** gamma * ce
    if reduction == "mean":
        return jnp.mean(focal)
    elif reduction == "sum":
        return jnp.sum(focal)
    return focal


if __name__ == "__main__":
    key = jax.random.PRNGKey(0)
    k_x, k_t = jax.random.split(key)

    # Small, ragged batch to exercise the padding path (N not a multiple of 128).
    N, C = 200, 16
    logits = jax.random.normal(k_x, (N, C), dtype=jnp.float32)
    targets = jax.random.randint(k_t, (N,), 0, C, dtype=jnp.int32)

    out_mean = jax.block_until_ready(focal_loss(logits, targets, reduction="mean"))
    ref_mean = _focal_loss_ref(logits, targets, reduction="mean")
    if not jnp.allclose(out_mean, ref_mean, rtol=1e-5, atol=1e-6):
        raise AssertionError(f"mean mismatch: kernel={out_mean} ref={ref_mean}")

    out_sum = jax.block_until_ready(focal_loss(logits, targets, reduction="sum"))
    ref_sum = _focal_loss_ref(logits, targets, reduction="sum")
    if not jnp.allclose(out_sum, ref_sum, rtol=1e-5, atol=1e-5):
        raise AssertionError(f"sum mismatch: kernel={out_sum} ref={ref_sum}")

    out_none = jax.block_until_ready(focal_loss(logits, targets, reduction="none"))
    ref_none = _focal_loss_ref(logits, targets, reduction="none")
    if not jnp.allclose(out_none, ref_none, rtol=1e-5, atol=1e-6):
        raise AssertionError("per-sample mismatch")

    print("KERNEL_OK")
</pallas_src>

<mosaic_0001>
module attributes {stable_mosaic.version = 11 : i64} {
  func.func @_focal_loss_kernel(%arg0: i32, %arg1: memref<16x256xf32, #tpu.memory_space<vmem>>, %arg2: memref<1x256xi32, #tpu.memory_space<vmem>>, %arg3: memref<1x256xf32, #tpu.memory_space<vmem>>) attributes {dimension_semantics = [#tpu.dimension_semantics<parallel>], iteration_bounds = array<i64: 1>, scalar_prefetch = 0 : i64, scratch_operands = 0 : i64, tpu.core_type = #tpu.core_type<tc>, window_params = [{transform_indices = @transform_0, window_bounds = array<i64: 16, 256>}, {transform_indices = @transform_1, window_bounds = array<i64: 1, 256>}, {transform_indices = @transform_2, window_bounds = array<i64: 1, 256>}]} {
    %c0 = arith.constant 0 : index
    %c0_0 = arith.constant 0 : index
    %0 = vector.load %arg1[%c0, %c0_0] : memref<16x256xf32, #tpu.memory_space<vmem>>, vector<16x256xf32>
    %c0_1 = arith.constant 0 : index
    %c0_2 = arith.constant 0 : index
    %1 = vector.load %arg2[%c0_1, %c0_2] : memref<1x256xi32, #tpu.memory_space<vmem>>, vector<1x256xi32>
    %2 = tpu.iota {dimensions = array<i32: 0>} : vector<16x256xi32>
    %3 = vector.broadcast %1 : vector<1x256xi32> to vector<16x256xi32>
    %4 = arith.cmpi eq, %2, %3 : vector<16x256xi32>
    %cst = arith.constant 0.000000e+00 : f32
    %5 = vector.broadcast %cst : f32 to vector<16x256xf32>
    %6 = arith.select %4, %0, %5 : vector<16x256xi1>, vector<16x256xf32>
    %cst_3 = arith.constant dense<0.000000e+00> : vector<256xf32>
    %7 = vector.multi_reduction <add>, %6, %cst_3 [0] : vector<16x256xf32> to vector<256xf32>
    %8 = vector.shape_cast %7 : vector<256xf32> to vector<1x256xf32>
    %cst_4 = arith.constant dense<0xFF800000> : vector<256xf32>
    %9 = vector.multi_reduction <maximumf>, %0, %cst_4 [0] : vector<16x256xf32> to vector<256xf32>
    %10 = vector.shape_cast %9 : vector<256xf32> to vector<1x256xf32>
    %11 = vector.broadcast %10 : vector<1x256xf32> to vector<16x256xf32>
    %12 = arith.subf %0, %11 : vector<16x256xf32>
    %13 = math.exp %12 : vector<16x256xf32>
    %cst_5 = arith.constant dense<0.000000e+00> : vector<256xf32>
    %14 = vector.multi_reduction <add>, %13, %cst_5 [0] : vector<16x256xf32> to vector<256xf32>
    %15 = vector.shape_cast %14 : vector<256xf32> to vector<1x256xf32>
    %16 = math.log %15 : vector<1x256xf32>
    %17 = arith.addf %10, %16 : vector<1x256xf32>
    %18 = arith.subf %17, %8 : vector<1x256xf32>
    %cst_6 = arith.constant 0.000000e+00 : f32
    %19 = vector.broadcast %cst_6 : f32 to vector<1x256xf32>
    %20 = arith.subf %19, %18 : vector<1x256xf32>
    %21 = math.exp %20 : vector<1x256xf32>
    %cst_7 = arith.constant 1.000000e+00 : f32
    %22 = vector.broadcast %cst_7 : f32 to vector<1x256xf32>
    %23 = arith.subf %22, %21 : vector<1x256xf32>
    %24 = arith.mulf %23, %23 : vector<1x256xf32>
    %25 = arith.mulf %24, %18 : vector<1x256xf32>
    %c0_8 = arith.constant 0 : index
    %c0_9 = arith.constant 0 : index
    %26 = vector.load %arg3[%c0_8, %c0_9] : memref<1x256xf32, #tpu.memory_space<vmem>>, vector<1x256xf32>
    tpu.vector_store %arg3[%c0_8, %c0_9], %25 {strides = array<i32>} : memref<1x256xf32, #tpu.memory_space<vmem>>, vector<1x256xf32>,
    return
  }
  func.func @transform_0(%arg0: i32) -> (i32, i32) {
    %c0_i32 = arith.constant 0 : i32
    %c0_i32_0 = arith.constant 0 : i32
    return %c0_i32, %arg0 : i32, i32
  }
  func.func @transform_1(%arg0: i32) -> (i32, i32) {
    %c0_i32 = arith.constant 0 : i32
    %c0_i32_0 = arith.constant 0 : i32
    return %c0_i32, %arg0 : i32, i32
  }
  func.func @transform_2(%arg0: i32) -> (i32, i32) {
    %c0_i32 = arith.constant 0 : i32
    %c0_i32_0 = arith.constant 0 : i32
    return %c0_i32, %arg0 : i32, i32
  }
}

</mosaic_0001>

<bundles_post_ra>
// kernel: tpu_custom_call.1
= control target key start
LH: loop header
LB: loop body
LE: loop exit
PB: predicated region body
PF: predicated region fallthrough
CT: control target
= control target key end

     0   :  { %7 = vsyncpa [#allocation3], 0  ;;  %s298_s0 = inlined_call_operand.hbm [shape: f32[16,256], index: 0, kind: input, shape index: {}]   ;;  %s299_s1 = inlined_call_operand.vmem [shape: s32[1,256], index: 1, kind: input, shape index: {}]   ;;  %s300_s2 = inlined_call_operand.hbm [shape: f32[1,256], index: 2, kind: output, shape index: {}]  }
   0x1   :  { %8 = vsyncpa [#allocation4], 0  ;;  %s231_s9 = smov [#allocation2]   ;;  %s183_s13 = scalar_lea.hbm %s298_s0, 512 }
   0x2   :  { %s14_s10 = sshll.u32 %s231_s9, 4  ;;  %p184_p0 = scmp.ne.s32.totalorder %s298_s0, %s183_s13  ;;  %s15_s10 = int_to_ptr.vmem [resolvable:$true] %s14_s10 }
   0x3   :  { %p187_p1 = scmp.lt.u32.totalorder %s183_s13, %s298_s0 }
   0x5   :  { %p189_p2 = pnand %p187_p1, %p184_p0 }
   0x7   :  { %192 = shalt.err (!%p189_p2)
}
   0x8   :  { %s193_s18 = scalar_lea.vmem %s15_s10, 512  ;;  %p198_p4 = scmp.lt.s32.totalorder %s15_s10, %s15_s10 }
   0x9   :  { %p194_p3 = scmp.ne.s32.totalorder %s15_s10, %s193_s18  ;;  %p199_p5 = scmp.lt.s32.totalorder %s193_s18, %s193_s18 }
   0xb   :  { %p200_p6 = por %p199_p5, %p198_p4 }
   0xd   :  { %p201_p7 = pnand %p200_p6, %p194_p3 }
   0xf   :  { %204 = shalt.err (!%p201_p7)
}
  0x10   :  { %s232_s19 = smov 256   ;;  %s233_s20 = smov 16  }
  0x11   :  { %20 = dma.hbm_to_vmem [thread:$0]  %s298_s0, 512, %s15_s10, [#allocation3], %s232_s19, %s232_s19, %s233_s20  }
  0x12   :  { %227 = dma.done.wait [#allocation3], 512  }
  0x13   :  { %228 = vsyncadd [#allocation3], 4294966784  ;;  %v26_v0 = vld [vmem:[#allocation2] sm:$0xff]  ;;  %v27_v1 = vld [vmem:[#allocation2 + $0x8] sm:$0xff]  ;;  %v31_v15 = vlaneseq }
  0x14   :  { %v28_v2 = vld [vmem:[#allocation2 + $0x10] sm:$0xff]  ;;  %v29_v3 = vld [vmem:[#allocation2 + $0x18] sm:$0xff]  ;;  %v30_v29 = vld [vmem:[%s299_s1] sm:$0x3]  ;;  %s235_s1 = smov [#allocation5]  }
  0x15   :  { %v64_v4 = vmax.f32 %v26_v0, %v28_v2  ;;  %v71_v5 = vmax.f32 %v27_v1, %v29_v3  ;;  %v269_v20 = vshrl.u32 %v31_v15, 7  ;;  %s153_s24 = sshll.u32 %s235_s1, 4  ;;  %vm144_vm4 = vcmp.lt.s32.totalorder %v31_v15, 256  ;;  %s154_s24 = int_to_ptr.vmem [resolvable:$true] %s153_s24 }
  0x16   :  { %s205_s25 = scalar_lea.vmem %s154_s24, 32  ;;  %p210_p9 = scmp.lt.s32.totalorder %s154_s24, %s154_s24 }
  0x17   :  { %v65_v6 = vrot.slane %v64_v4, 4  ;;  %v72_v8 = vrot.slane %v71_v5, 4  ;;  %v36_v28 = vsub.s32 0, %v269_v20  ;;  %v40_v30 = vsub.s32 1, %v269_v20  ;;  %p206_p8 = scmp.ne.s32.totalorder %s154_s24, %s205_s25  ;;  %p211_p10 = scmp.lt.s32.totalorder %s205_s25, %s205_s25 }
  0x18   :  { %v33_v31 = vadd.s32 8, %v269_v20 }
  0x19   :  { %v66_v7 = vmax.f32 %v64_v4, %v65_v6  ;;  %v73_v10 = vmax.f32 %v71_v5, %v72_v8  ;;  %v37_v32 = vrot.slane %v30_v29, %v36_v28  ;;  %v41_v33 = vrot.slane %v30_v29, %v40_v30  ;;  %p212_p11 = por %p211_p10, %p210_p9 }
  0x1b   :  { %v67_v9 = vrot.slane %v66_v7, 2  ;;  %v74_v12 = vrot.slane %v73_v10, 2  ;;  %vm42_vm0 = vcmp.eq.s32.totalorder %v269_v20, %v37_v32  ;;  %vm44_vm1 = vcmp.eq.s32.totalorder %v33_v31, %v37_v32  ;;  %p213_p12 = pnand %p212_p11, %p206_p8 }
  0x1c   :  { %vm43_vm2 = vcmp.eq.s32.totalorder %v269_v20, %v41_v33  ;;  %vm45_vm3 = vcmp.eq.s32.totalorder %v33_v31, %v41_v33  ;;  %v46_v36 = vsel %vm42_vm0, %v26_v0, 0.0  ;;  %v48_v37 = vsel %vm44_vm1, %v28_v2, 0.0 }
  0x1d   :  { %v68_v11 = vmax.f32 %v66_v7, %v67_v9  ;;  %v75_v14 = vmax.f32 %v73_v10, %v74_v12  ;;  %v47_v39 = vsel %vm43_vm2, %v27_v1, 0.0  ;;  %v49_v40 = vsel %vm45_vm3, %v29_v3, 0.0 }
  0x1e   :  { %v50_v43 = vadd.f32 %v48_v37, %v46_v36  ;;  %v57_v45 = vadd.f32 %v49_v40, %v47_v39 }
  0x1f   :  { %v69_v13 = vrot.slane %v68_v11, 1  ;;  %v76_v17 = vrot.slane %v75_v14, 1 }
  0x20   :  { %v51_v49 = vrot.slane %v50_v43, 4  ;;  %v58_v51 = vrot.slane %v57_v45, 4 }
  0x21   :  { %v263_v16 = vmax.f32 %v68_v11, %v69_v13  ;;  %v265_v18 = vmax.f32 %v75_v14, %v76_v17 }
  0x22   :  { %v52_v55 = vadd.f32 %v51_v49, %v50_v43  ;;  %v59_v57 = vadd.f32 %v58_v51, %v57_v45 }
  0x23   :  { %v78_v19 = vsub.f32 %v26_v0, %v263_v16  ;;  %v80_v21 = vsub.f32 %v28_v2, %v263_v16  ;;  %v79_v22 = vsub.f32 %v27_v1, %v265_v18  ;;  %v81_v23 = vsub.f32 %v29_v3, %v265_v18 }
  0x24   :  { %v53_v61 = vrot.slane %v52_v55, 2  ;;  %v60_v63 = vrot.slane %v59_v57, 2 }
  0x25   :  { %v82_v24 = vmul.f32 1.442695, %v78_v19  ;;  %v86_v25 = vmul.f32 1.442695, %v80_v21  ;;  %v84_v26 = vmul.f32 1.442695, %v79_v22 }
  0x26   :  { %v88_v27 = vmul.f32 1.442695, %v81_v23  ;;  %v54_v0 = vadd.f32 %v53_v61, %v52_v55  ;;  %v61_v1 = vadd.f32 %v60_v63, %v59_v57  ;;  %v234_v22 = vmov 1966171168  }
  0x27   :  { %167 = vpow2.f32 %v82_v24  ;;  %v128_v23 = vunpack.c.l.s4 %v234_v22 }
  0x28   :  { %169 = vpow2.f32 %v84_v26  ;;  %v55_v2 = vrot.slane %v54_v0, 1  ;;  %v62_v3 = vrot.slane %v61_v1, 1 }
  0x29   :  { %171 = vpow2.f32 %v86_v25  ;;  %v129_v28 = vunpack.c.0.s8 %v128_v23 }
  0x2a   :  { %173 = vpow2.f32 %v88_v27  ;;  %v56_v6 = vadd.f32 %v55_v2, %v54_v0  ;;  %v63_v8 = vadd.f32 %v62_v3, %v61_v1 }
  0x31   :  { %v168_v34 = vpop.eup %167 }
  0x32   :  { %v170_v35 = vpop.eup %169 }
  0x33   :  { %v172_v38 = vpop.eup %171 }
  0x34   :  { %v174_v41 = vpop.eup %173  ;;  %v90_v42 = vadd.f32 %v172_v38, %v168_v34 }
  0x35   :  { %v97_v44 = vadd.f32 %v174_v41, %v170_v35 }
  0x36   :  { %v91_v46 = vrot.slane %v90_v42, 4 }
  0x37   :  { %v98_v47 = vrot.slane %v97_v44, 4 }
  0x38   :  { %v92_v48 = vadd.f32 %v91_v46, %v90_v42 }
  0x39   :  { %v99_v50 = vadd.f32 %v98_v47, %v97_v44 }
  0x3a   :  { %v93_v52 = vrot.slane %v92_v48, 2 }
  0x3b   :  { %v100_v53 = vrot.slane %v99_v50, 2 }
  0x3c   :  { %v94_v54 = vadd.f32 %v93_v52, %v92_v48 }
  0x3d   :  { %v101_v56 = vadd.f32 %v100_v53, %v99_v50 }
  0x3e   :  { %v95_v58 = vrot.slane %v94_v54, 1 }
  0x3f   :  { %v102_v59 = vrot.slane %v101_v56, 1 }
  0x40   :  { %v96_v60 = vadd.f32 %v95_v58, %v94_v54 }
  0x41   :  { %v103_v62 = vadd.f32 %v102_v59, %v101_v56 }
  0x42   :  { %175 = vlog2.f32 %v96_v60 }
  0x43   :  { %177 = vlog2.f32 %v103_v62 }
  0x4c   :  { %v176_v4 = vpop.eup %175 }
  0x4d   :  { %v178_v5 = vpop.eup %177  ;;  %v105_v7 = vmul.f32 0.6931472, %v176_v4 }
  0x4e   :  { %v107_v9 = vmul.f32 0.6931472, %v178_v5 }
  0x4f   :  { %v108_v10 = vadd.f32 %v105_v7, %v263_v16 }
  0x50   :  { %v109_v11 = vadd.f32 %v107_v9, %v265_v18  ;;  %v132_v18 = vsub.s32 %v129_v28, %v269_v20 }
  0x51   :  { %v110_v12 = vsub.f32 %v108_v10, %v56_v6 }
  0x52   :  { %v111_v13 = vsub.f32 %v109_v11, %v63_v8 }
  0x53   :  { %v112_v14 = vsub.f32 0.0, %v110_v12 }
  0x54   :  { %v113_v17 = vsub.f32 0.0, %v111_v13 }
  0x55   :  { %v114_v19 = vmul.f32 1.442695, %v112_v14 }
  0x56   :  { %v116_v21 = vmul.f32 1.442695, %v113_v17 }
  0x57   :  { %179 = vpow2.f32 %v114_v19 }
  0x58   :  { %181 = vpow2.f32 %v116_v21 }
  0x61   :  { %v180_v24 = vpop.eup %179 }
  0x62   :  { %v182_v25 = vpop.eup %181  ;;  %v118_v26 = vsub.f32 1.0, %v180_v24 }
  0x63   :  { %v119_v27 = vsub.f32 1.0, %v182_v25 }
  0x64   :  { %v120_v29 = vmul.f32 %v118_v26, %v118_v26 }
  0x65   :  { %v121_v30 = vmul.f32 %v119_v27, %v119_v27 }
  0x66   :  { %v122_v16 = vmul.f32 %v120_v29, %v110_v12 }
  0x67   :  { %v123_v31 = vmul.f32 %v121_v30, %v111_v13 }
  0x69   :  { %v126_v32 = vcombine.low %v122_v16, %v123_v31 }
  0x6b   :  { %v133_v33 = vrot.slane %v126_v32, %v132_v18 }
  0x6d   :  { %v140_v34 = vrot.slane %v133_v33, %v132_v18 }
  0x6f   :  { %146 = vst.msk [vmem:[#allocation5] sm:$0x3] %vm144_vm4, %v140_v34 }
  0x70   :  { %216 = shalt.err (!%p213_p12)
}
  0x71   :  { %s217_s28 = scalar_lea.hbm %s300_s2, 32 }
  0x72   :  { %p218_p13 = scmp.ne.s32.totalorder %s300_s2, %s217_s28  ;;  %p221_p0 = scmp.lt.u32.totalorder %s217_s28, %s300_s2 }
  0x74   :  { %p223_p1 = pnand %p221_p0, %p218_p13 }
  0x76   :  { %226 = shalt.err (!%p223_p1)
}
  0x77   :  { %156 = dma.vmem_to_hbm [thread:$0]  %s154_s24, 32, %s300_s2, [#allocation4]  }
  0x78   :  { %229 = dma.done.wait [#allocation4], 32  }
  0x79   :  { %230 = vsyncadd [#allocation4], 4294967264 }
  0x7a   :  { %160 = vsyncpa [#allocation3], 1 }
  0x7b   :  { %161 = vsyncpa [#allocation4], 1 }

</bundles_post_ra>
